<compile_context>
chip_gen: v5e
topology: v5e:2x2
jax: 0.10.0
libtpu: 0.0.40
codegen_flags: <defaults>
</compile_context>

<pallas_src>
import functools

import jax
import jax.numpy as jnp
from jax.experimental import pallas as pl
from jax.experimental.pallas import tpu as pltpu


def _round_up(a, b):
    return (a + b - 1) // b * b


def _patch_embed_kernel(x_ref, w_ref, b_ref, o_ref):
    # x_ref: (TM, Kp) patches, w_ref: (Kp, Ep), b_ref: (1, Ep) f32, o_ref: (TM, Ep)
    acc = jnp.dot(x_ref[...], w_ref[...], preferred_element_type=jnp.float32)
    o_ref[...] = (acc + b_ref[...]).astype(o_ref.dtype)


@functools.partial(jax.jit, static_argnames=("patch_size", "tm", "compute_dtype"))
def patch_embedding(x, weight, bias, patch_size, *, tm=512, compute_dtype=None):
    """x: (B, C, H, W) NCHW; weight: (E, C, P, P); bias: (E,). Returns (B, N, E)."""
    B, C, H, W = x.shape
    E = weight.shape[0]
    P = patch_size
    if H % P != 0 or W % P != 0:
        raise ValueError("H and W must be divisible by patch_size")
    Hp, Wp = H // P, W // P
    N = Hp * Wp
    K = C * P * P
    M = B * N

    out_dtype = x.dtype
    if compute_dtype is None:
        compute_dtype = x.dtype  # keep module numerics (f32) by default

    # --- layout glue: extract non-overlapping patches, (c, ph, pw)-major to
    #     match PyTorch Conv2d weight flattening order.
    patches = x.reshape(B, C, Hp, P, Wp, P)
    patches = patches.transpose(0, 2, 4, 1, 3, 5)            # (B, Hp, Wp, C, P, P)
    patches = patches.reshape(M, K)                           # (M, K)

    w2d = weight.reshape(E, K).T                               # (K, E)
    b2d = bias.reshape(1, E).astype(jnp.float32)               # (1, E), f32 add

    # --- pad K and E up to 128 (MXU fill, lane-dense output stores); pad M up
    #     to a multiple of the row tile TM.  No-ops for aligned shapes.
    Kp = _round_up(K, 128)
    Ep = _round_up(E, 128)
    TM = min(tm, _round_up(M, 128))
    Mp = _round_up(M, TM)

    if (Mp, Kp) != (M, K):
        patches = jnp.pad(patches, ((0, Mp - M), (0, Kp - K)))
    if (Kp, Ep) != (K, E):
        w2d = jnp.pad(w2d, ((0, Kp - K), (0, Ep - E)))
    if Ep != E:
        b2d = jnp.pad(b2d, ((0, 0), (0, Ep - E)))

    patches = patches.astype(compute_dtype)
    w2d = w2d.astype(compute_dtype)

    in_bytes = jnp.dtype(compute_dtype).itemsize
    out_bytes = jnp.dtype(out_dtype).itemsize
    cost = pl.CostEstimate(
        flops=2 * Mp * Kp * Ep,
        transcendentals=0,
        bytes_accessed=(Mp * Kp + Kp * Ep) * in_bytes
        + Ep * 4
        + Mp * Ep * out_bytes,
    )

    out = pl.pallas_call(
        _patch_embed_kernel,
        out_shape=jax.ShapeDtypeStruct((Mp, Ep), out_dtype),
        grid_spec=pltpu.PrefetchScalarGridSpec(
            num_scalar_prefetch=0,
            grid=(Mp // TM,),
            in_specs=[
                pl.BlockSpec((TM, Kp), lambda i: (i, 0)),   # streamed patch tiles
                pl.BlockSpec((Kp, Ep), lambda i: (0, 0)),   # resident weight
                pl.BlockSpec((1, Ep), lambda i: (0, 0)),    # resident bias (f32)
            ],
            out_specs=pl.BlockSpec((TM, Ep), lambda i: (i, 0)),
        ),
        compiler_params=pltpu.CompilerParams(
            dimension_semantics=("parallel",)),
        cost_estimate=cost,
    )(patches, w2d, b2d)

    return out[:M, :E].reshape(B, N, E)


if __name__ == "__main__":
    # Small shapes consistent with the module: B=2, C=4, H=W=16, P=4, E=32.
    B, C, H, W = 2, 4, 16, 16
    P, E = 4, 32

    key = jax.random.PRNGKey(0)
    kx, kw, kb = jax.random.split(key, 3)
    x = jax.random.normal(kx, (B, C, H, W), dtype=jnp.float32)
    # Deterministic synthetic parameters (Conv2d weight/bias shapes).
    weight = jax.random.normal(kw, (E, C, P, P), dtype=jnp.float32) * 0.02
    bias = jax.random.normal(kb, (E,), dtype=jnp.float32) * 0.02

    out = patch_embedding(x, weight, bias, P)
    out = jax.block_until_ready(out)

    # Reference: same math in plain JAX (strided conv == patch GEMM).
    Hp, Wp = H // P, W // P
    ref_patches = x.reshape(B, C, Hp, P, Wp, P).transpose(0, 2, 4, 1, 3, 5)
    ref_patches = ref_patches.reshape(B, Hp * Wp, C * P * P)
    ref = jnp.einsum("bnk,ek->bne", ref_patches, weight.reshape(E, -1)) + bias

    assert out.shape == (B, Hp * Wp, E)
    assert jnp.allclose(out, ref, atol=1e-4, rtol=1e-4)
    print("KERNEL_OK")
</pallas_src>

<mosaic_0001>
module attributes {stable_mosaic.version = 11 : i64} {
  func.func @_patch_embed_kernel(%arg0: i32, %arg1: memref<128x128xf32, #tpu.memory_space<vmem>>, %arg2: memref<128x128xf32, #tpu.memory_space<vmem>>, %arg3: memref<1x128xf32, #tpu.memory_space<vmem>>, %arg4: memref<128x128xf32, #tpu.memory_space<vmem>>) attributes {dimension_semantics = [#tpu.dimension_semantics<parallel>], iteration_bounds = array<i64: 1>, scalar_prefetch = 0 : i64, scratch_operands = 0 : i64, tpu.core_type = #tpu.core_type<tc>, window_params = [{transform_indices = @transform_0, window_bounds = array<i64: 128, 128>}, {pipeline_mode = #tpu.pipeline_mode<synchronous>, transform_indices = @transform_1, window_bounds = array<i64: 128, 128>}, {pipeline_mode = #tpu.pipeline_mode<synchronous>, transform_indices = @transform_2, window_bounds = array<i64: 1, 128>}, {transform_indices = @transform_3, window_bounds = array<i64: 128, 128>}]} {
    %c0 = arith.constant 0 : index
    %c0_0 = arith.constant 0 : index
    %0 = vector.load %arg1[%c0, %c0_0] : memref<128x128xf32, #tpu.memory_space<vmem>>, vector<128x128xf32>
    %c0_1 = arith.constant 0 : index
    %c0_2 = arith.constant 0 : index
    %1 = vector.load %arg2[%c0_1, %c0_2] : memref<128x128xf32, #tpu.memory_space<vmem>>, vector<128x128xf32>
    %cst = arith.constant dense<0.000000e+00> : vector<128x128xf32>
    %2 = tpu.matmul %0, %1, %cst {dimension_numbers = #tpu.dot_dimension_numbers<[1], [0], [0], [1], [0, 0, 1, 1], [], []>} : vector<128x128xf32>, vector<128x128xf32>, vector<128x128xf32> -> vector<128x128xf32>
    %c0_3 = arith.constant 0 : index
    %c0_4 = arith.constant 0 : index
    %3 = vector.load %arg3[%c0_3, %c0_4] : memref<1x128xf32, #tpu.memory_space<vmem>>, vector<1x128xf32>
    %4 = vector.broadcast %3 : vector<1x128xf32> to vector<128x128xf32>
    %5 = arith.addf %2, %4 : vector<128x128xf32>
    %c0_5 = arith.constant 0 : index
    %c0_6 = arith.constant 0 : index
    %6 = vector.load %arg4[%c0_5, %c0_6] : memref<128x128xf32, #tpu.memory_space<vmem>>, vector<128x128xf32>
    tpu.vector_store %arg4[%c0_5, %c0_6], %5 {strides = array<i32>} : memref<128x128xf32, #tpu.memory_space<vmem>>, vector<128x128xf32>,
    return
  }
  func.func @transform_0(%arg0: i32) -> (i32, i32) {
    %c0_i32 = arith.constant 0 : i32
    %c0_i32_0 = arith.constant 0 : i32
    return %arg0, %c0_i32 : i32, i32
  }
  func.func @transform_1(%arg0: i32) -> (i32, i32) {
    %c0_i32 = arith.constant 0 : i32
    %c0_i32_0 = arith.constant 0 : i32
    %c0_i32_1 = arith.constant 0 : i32
    return %c0_i32, %c0_i32_0 : i32, i32
  }
  func.func @transform_2(%arg0: i32) -> (i32, i32) {
    %c0_i32 = arith.constant 0 : i32
    %c0_i32_0 = arith.constant 0 : i32
    %c0_i32_1 = arith.constant 0 : i32
    return %c0_i32, %c0_i32_0 : i32, i32
  }
  func.func @transform_3(%arg0: i32) -> (i32, i32) {
    %c0_i32 = arith.constant 0 : i32
    %c0_i32_0 = arith.constant 0 : i32
    return %arg0, %c0_i32 : i32, i32
  }
}

</mosaic_0001>

<bundles_post_ra>
// kernel: patch_embedding.1
= control target key start
LH: loop header
LB: loop body
LE: loop exit
PB: predicated region body
PF: predicated region fallthrough
CT: control target
= control target key end

     0   :  { %s351_s1 = inlined_call_operand.vmem [shape: f32[128,128], index: 1, kind: input, shape index: {}]   ;;  %s352_s2 = inlined_call_operand.vmem [shape: f32[1,128], index: 2, kind: input, shape index: {}]   ;;  %s353_s0 = inlined_call_operand.vmem [shape: f32[128,128], index: 0, kind: input, shape index: {}]   ;;  %s354_s3 = inlined_call_operand.vmem [shape: f32[128,128], index: 3, kind: output, shape index: {}]  }
   0x1   :  { %v45_v0 = vld [vmem:[%s351_s1 + $0x78] sm:$0xff]  ;;  %v44_v1 = vld [vmem:[%s351_s1 + $0x70] sm:$0xff]  ;;  %v43_v2 = vld [vmem:[%s351_s1 + $0x68] sm:$0xff] }
   0x2   :  { %136 = vmatpush.msra.mxu2 %v45_v0  ;;  %137 = vmatpush.msra.mxu3 %v45_v0  ;;  %v42_v3 = vld [vmem:[%s351_s1 + $0x60] sm:$0xff]  ;;  %v41_v4 = vld [vmem:[%s351_s1 + $0x58] sm:$0xff]  ;;  %v40_v5 = vld [vmem:[%s351_s1 + $0x50] sm:$0xff] }
   0x3   :  { %50 = vmatpush.msra.mxu0 %v45_v0  ;;  %135 = vmatpush.msra.mxu1 %v45_v0  ;;  %v39_v6 = vld [vmem:[%s351_s1 + $0x48] sm:$0xff]  ;;  %v38_v7 = vld [vmem:[%s351_s1 + $0x40] sm:$0xff]  ;;  %v37_v8 = vld [vmem:[%s351_s1 + $0x38] sm:$0xff] }
   0x4   :  { %139 = vmatpush.msra.mxu2 %v44_v1  ;;  %140 = vmatpush.msra.mxu3 %v44_v1  ;;  %v36_v9 = vld [vmem:[%s351_s1 + $0x30] sm:$0xff]  ;;  %v35_v10 = vld [vmem:[%s351_s1 + $0x28] sm:$0xff]  ;;  %v34_v11 = vld [vmem:[%s351_s1 + $0x20] sm:$0xff] }
   0x5   :  { %51 = vmatpush.msra.mxu0 %v44_v1  ;;  %138 = vmatpush.msra.mxu1 %v44_v1  ;;  %v33_v12 = vld [vmem:[%s351_s1 + $0x18] sm:$0xff]  ;;  %v32_v13 = vld [vmem:[%s351_s1 + $0x10] sm:$0xff]  ;;  %v31_v14 = vld [vmem:[%s351_s1 + $0x8] sm:$0xff] }
   0x6   :  { %142 = vmatpush.msra.mxu2 %v43_v2  ;;  %143 = vmatpush.msra.mxu3 %v43_v2  ;;  %v30_v15 = vld [vmem:[%s351_s1] sm:$0xff]  ;;  %v23_v20 = vld [vmem:[%s353_s0 + $0x48] sm:$0xff]  ;;  %v24_v24 = vld [vmem:[%s353_s0 + $0x50] sm:$0xff] }
   0x7   :  { %52 = vmatpush.msra.mxu0 %v43_v2  ;;  %141 = vmatpush.msra.mxu1 %v43_v2  ;;  %v22_v16 = vld [vmem:[%s353_s0 + $0x40] sm:$0xff]  ;;  %v27_v21 = vld [vmem:[%s353_s0 + $0x68] sm:$0xff]  ;;  %v28_v25 = vld [vmem:[%s353_s0 + $0x70] sm:$0xff] }
   0x8   :  { %145 = vmatpush.msra.mxu2 %v42_v3  ;;  %146 = vmatpush.msra.mxu3 %v42_v3  ;;  %v26_v17 = vld [vmem:[%s353_s0 + $0x60] sm:$0xff]  ;;  %v15_v22 = vld [vmem:[%s353_s0 + $0x8] sm:$0xff]  ;;  %v16_v26 = vld [vmem:[%s353_s0 + $0x10] sm:$0xff] }
   0x9   :  { %53 = vmatpush.msra.mxu0 %v42_v3  ;;  %144 = vmatpush.msra.mxu1 %v42_v3  ;;  %v14_v18 = vld [vmem:[%s353_s0] sm:$0xff]  ;;  %v19_v23 = vld [vmem:[%s353_s0 + $0x28] sm:$0xff]  ;;  %v20_v27 = vld [vmem:[%s353_s0 + $0x30] sm:$0xff] }
   0xa   :  { %148 = vmatpush.msra.mxu2 %v41_v4  ;;  %149 = vmatpush.msra.mxu3 %v41_v4  ;;  %v18_v19 = vld [vmem:[%s353_s0 + $0x20] sm:$0xff]  ;;  %v25_v28 = vld [vmem:[%s353_s0 + $0x58] sm:$0xff] }
   0xb   :  { %54 = vmatpush.msra.mxu0 %v41_v4  ;;  %147 = vmatpush.msra.mxu1 %v41_v4  ;;  %v29_v29 = vld [vmem:[%s353_s0 + $0x78] sm:$0xff]  ;;  %v183_v32 = vld [vmem:[%s352_s2] ss:$0 sm:$0xff] }
   0xc   :  { %151 = vmatpush.msra.mxu2 %v40_v5  ;;  %152 = vmatpush.msra.mxu3 %v40_v5  ;;  %v17_v30 = vld [vmem:[%s353_s0 + $0x18] sm:$0xff] }
   0xd   :  { %55 = vmatpush.msra.mxu0 %v40_v5  ;;  %150 = vmatpush.msra.mxu1 %v40_v5  ;;  %v21_v31 = vld [vmem:[%s353_s0 + $0x38] sm:$0xff] }
   0xe   :  { %154 = vmatpush.msra.mxu2 %v39_v6  ;;  %155 = vmatpush.msra.mxu3 %v39_v6 }
   0xf   :  { %56 = vmatpush.msra.mxu0 %v39_v6  ;;  %153 = vmatpush.msra.mxu1 %v39_v6 }
  0x10   :  { %157 = vmatpush.msra.mxu2 %v38_v7  ;;  %158 = vmatpush.msra.mxu3 %v38_v7 }
  0x11   :  { %57 = vmatpush.msra.mxu0 %v38_v7  ;;  %156 = vmatpush.msra.mxu1 %v38_v7 }
  0x12   :  { %160 = vmatpush.msra.mxu2 %v37_v8  ;;  %161 = vmatpush.msra.mxu3 %v37_v8 }
  0x13   :  { %58 = vmatpush.msra.mxu0 %v37_v8  ;;  %159 = vmatpush.msra.mxu1 %v37_v8 }
  0x14   :  { %163 = vmatpush.msra.mxu2 %v36_v9  ;;  %164 = vmatpush.msra.mxu3 %v36_v9 }
  0x15   :  { %59 = vmatpush.msra.mxu0 %v36_v9  ;;  %162 = vmatpush.msra.mxu1 %v36_v9 }
  0x16   :  { %166 = vmatpush.msra.mxu2 %v35_v10  ;;  %167 = vmatpush.msra.mxu3 %v35_v10 }
  0x17   :  { %60 = vmatpush.msra.mxu0 %v35_v10  ;;  %165 = vmatpush.msra.mxu1 %v35_v10 }
  0x18   :  { %169 = vmatpush.msra.mxu2 %v34_v11  ;;  %170 = vmatpush.msra.mxu3 %v34_v11 }
  0x19   :  { %61 = vmatpush.msra.mxu0 %v34_v11  ;;  %168 = vmatpush.msra.mxu1 %v34_v11 }
  0x1a   :  { %172 = vmatpush.msra.mxu2 %v33_v12  ;;  %173 = vmatpush.msra.mxu3 %v33_v12 }
  0x1b   :  { %62 = vmatpush.msra.mxu0 %v33_v12  ;;  %171 = vmatpush.msra.mxu1 %v33_v12 }
  0x1c   :  { %175 = vmatpush.msra.mxu2 %v32_v13  ;;  %176 = vmatpush.msra.mxu3 %v32_v13 }
  0x1d   :  { %63 = vmatpush.msra.mxu0 %v32_v13  ;;  %174 = vmatpush.msra.mxu1 %v32_v13 }
  0x1e   :  { %178 = vmatpush.msra.mxu2 %v31_v14  ;;  %179 = vmatpush.msra.mxu3 %v31_v14 }
  0x1f   :  { %64 = vmatpush.msra.mxu0 %v31_v14  ;;  %177 = vmatpush.msra.mxu1 %v31_v14 }
  0x20   :  { %181 = vmatpush.msra.mxu2 %v30_v15  ;;  %182 = vmatpush.msra.mxu3 %v30_v15 }
  0x21   :  { %90 = vmatmul.f32.vlgmr.msra.gmra.mxu2 %v22_v16  ;;  %102 = vmatmul.f32.vlgmr.msra.gmra.mxu3 %v26_v17 }
  0x22   :  { %65 = vmatpush.msra.mxu0 %v30_v15  ;;  %180 = vmatpush.msra.mxu1 %v30_v15 }
  0x23   :  { %66 = vmatmul.f32.vlgmr.msra.gmra.mxu0 %v14_v18  ;;  %78 = vmatmul.f32.vlgmr.msra.gmra.mxu1 %v18_v19 }
  0x29   :  { %93 = vmatmul.f32.gmra.mxu2 %v23_v20  ;;  %105 = vmatmul.f32.gmra.mxu3 %v27_v21 }
  0x2b   :  { %69 = vmatmul.f32.gmra.mxu0 %v15_v22  ;;  %81 = vmatmul.f32.gmra.mxu1 %v19_v23 }
  0x31   :  { %96 = vmatmul.f32.gmra.mxu2 %v24_v24  ;;  %108 = vmatmul.f32.gmra.mxu3 %v28_v25 }
  0x33   :  { %72 = vmatmul.f32.gmra.mxu0 %v16_v26  ;;  %84 = vmatmul.f32.gmra.mxu1 %v20_v27 }
  0x39   :  { %99 = vmatmul.f32.gmra.mxu2 %v25_v28  ;;  %111 = vmatmul.f32.gmra.mxu3 %v29_v29 }
  0x3b   :  { %75 = vmatmul.f32.gmra.mxu0 %v17_v30  ;;  %87 = vmatmul.f32.gmra.mxu1 %v21_v31 }
  0xa0   :  { %v67_v33 = vpop.f32.mrf.mxu0  ;;  %v79_v34 = vpop.f32.mrf.mxu1 }
  0xa1   :  { %v68_v35 = vadd.f32 %v183_v32, %v67_v33  ;;  %v80_v36 = vadd.f32 %v183_v32, %v79_v34 }
  0xa3   :  { %115 = vst [vmem:[%s354_s3] sm:$0xff] %v68_v35 }
  0xa4   :  { %119 = vst [vmem:[%s354_s3 + $0x20] sm:$0xff] %v80_v36  ;;  %v91_v37 = vpop.f32.mrf.mxu2  ;;  %v103_v38 = vpop.f32.mrf.mxu3 }
  0xa5   :  { %v92_v39 = vadd.f32 %v183_v32, %v91_v37  ;;  %v104_v40 = vadd.f32 %v183_v32, %v103_v38 }
  0xa7   :  { %123 = vst [vmem:[%s354_s3 + $0x40] sm:$0xff] %v92_v39 }
  0xa8   :  { %127 = vst [vmem:[%s354_s3 + $0x60] sm:$0xff] %v104_v40  ;;  %v70_v41 = vpop.f32.mrf.mxu0  ;;  %v82_v42 = vpop.f32.mrf.mxu1 }
  0xa9   :  { %v71_v43 = vadd.f32 %v183_v32, %v70_v41  ;;  %v83_v44 = vadd.f32 %v183_v32, %v82_v42 }
  0xab   :  { %116 = vst [vmem:[%s354_s3 + $0x8] sm:$0xff] %v71_v43 }
  0xac   :  { %120 = vst [vmem:[%s354_s3 + $0x28] sm:$0xff] %v83_v44  ;;  %v94_v45 = vpop.f32.mrf.mxu2  ;;  %v106_v46 = vpop.f32.mrf.mxu3 }
  0xad   :  { %v95_v47 = vadd.f32 %v183_v32, %v94_v45  ;;  %v107_v48 = vadd.f32 %v183_v32, %v106_v46 }
  0xaf   :  { %124 = vst [vmem:[%s354_s3 + $0x48] sm:$0xff] %v95_v47 }
  0xb0   :  { %128 = vst [vmem:[%s354_s3 + $0x68] sm:$0xff] %v107_v48  ;;  %v73_v49 = vpop.f32.mrf.mxu0  ;;  %v85_v50 = vpop.f32.mrf.mxu1 }
  0xb1   :  { %v74_v51 = vadd.f32 %v183_v32, %v73_v49  ;;  %v86_v52 = vadd.f32 %v183_v32, %v85_v50 }
  0xb3   :  { %117 = vst [vmem:[%s354_s3 + $0x10] sm:$0xff] %v74_v51 }
  0xb4   :  { %121 = vst [vmem:[%s354_s3 + $0x30] sm:$0xff] %v86_v52  ;;  %v97_v53 = vpop.f32.mrf.mxu2  ;;  %v109_v54 = vpop.f32.mrf.mxu3 }
  0xb5   :  { %v98_v55 = vadd.f32 %v183_v32, %v97_v53  ;;  %v110_v56 = vadd.f32 %v183_v32, %v109_v54 }
  0xb7   :  { %125 = vst [vmem:[%s354_s3 + $0x50] sm:$0xff] %v98_v55 }
  0xb8   :  { %129 = vst [vmem:[%s354_s3 + $0x70] sm:$0xff] %v110_v56  ;;  %v76_v57 = vpop.f32.mrf.mxu0  ;;  %v88_v58 = vpop.f32.mrf.mxu1 }
  0xb9   :  { %v77_v59 = vadd.f32 %v183_v32, %v76_v57  ;;  %v89_v60 = vadd.f32 %v183_v32, %v88_v58 }
  0xbb   :  { %118 = vst [vmem:[%s354_s3 + $0x18] sm:$0xff] %v77_v59 }
  0xbc   :  { %122 = vst [vmem:[%s354_s3 + $0x38] sm:$0xff] %v89_v60  ;;  %v100_v61 = vpop.f32.mrf.mxu2  ;;  %v112_v62 = vpop.f32.mrf.mxu3 }
  0xbd   :  { %v101_v63 = vadd.f32 %v183_v32, %v100_v61  ;;  %v113_v0 = vadd.f32 %v183_v32, %v112_v62 }
  0xbf   :  { %126 = vst [vmem:[%s354_s3 + $0x58] sm:$0xff] %v101_v63 }
  0xc0   :  { %130 = vst [vmem:[%s354_s3 + $0x78] sm:$0xff] %v113_v0 }

</bundles_post_ra>
